<compile_context>
chip_gen: v7x
topology: tpu7x:2x2x1
jax: 0.10.0
libtpu: 0.0.40
codegen_flags: <defaults>
</compile_context>

<pallas_src>
import functools

import numpy as np

import jax
import jax.numpy as jnp
from jax.experimental import pallas as pl
from jax.experimental.pallas import tpu as pltpu

_SUBLANE = 8
_LANE = 128


def _round_down(v, m):
    return (v // m) * m


def _round_up(v, m):
    return ((v + m - 1) // m) * m


def _physical_vmem_bytes():
    try:
        info = pltpu.get_tpu_info()
        cap = getattr(info, "vmem_capacity_bytes", None)
        if cap:
            return int(cap)
    except Exception:
        pass
    return 64 * 1024 * 1024  # conservative: assume v7x-sized VMEM


def _layernorm(x, alpha, beta, eps, feat_dim, fast):
    """PyTorch LayerNorm semantics: unbiased std (ddof=1), eps added to std."""
    mean = jnp.mean(x, axis=-1, keepdims=True)
    var = jnp.sum((x - mean) ** 2, axis=-1, keepdims=True) / (feat_dim - 1)
    denom = jnp.sqrt(var) + eps
    if fast:
        return alpha * ((x - mean) * pl.reciprocal(denom, approx=True)) + beta
    return alpha * ((x - mean) / denom) + beta


# --------------------------------------------------------------------------
# Kernel bodies
# --------------------------------------------------------------------------
def _resident_kernel(x_ref, alpha_ref, beta_ref, w1_ref, b1_ref, w2_ref, b2_ref,
                     o_ref, *, eps, feat_dim, compute_dtype, fast):
    """Whole weights VMEM-resident; grid = (token_tiles,)."""
    x = x_ref[...].astype(jnp.float32)
    xn = _layernorm(x, alpha_ref[0], beta_ref[0], eps, feat_dim, fast)
    xn_c = xn.astype(compute_dtype)
    h = jnp.dot(xn_c, w1_ref[...], preferred_element_type=jnp.float32) + b1_ref[...]
    h = jnp.maximum(h, 0.0).astype(compute_dtype)          # ReLU
    y = jnp.dot(h, w2_ref[...], preferred_element_type=jnp.float32) + b2_ref[...]
    # dropout (eval mode) == identity; residual add fused into the store.
    # TODO(synk): train-mode dropout would need pltpu.prng_seed/prng_random_bits
    # with 1/(1-p) scaling.
    o_ref[...] = (x + y).astype(o_ref.dtype)


def _chunked_kernel_accout(x_ref, alpha_ref, beta_ref, w1_ref, b1_ref, w2_ref,
                           b2_ref, o_ref, xn_ref, *, eps, feat_dim,
                           compute_dtype, fast):
    """F-chunked reduction; f32 output block doubles as the accumulator."""
    k = pl.program_id(1)

    @pl.when(k == 0)
    def _init():
        x = x_ref[...].astype(jnp.float32)
        xn_ref[...] = _layernorm(x, alpha_ref[0], beta_ref[0], eps, feat_dim,
                                 fast).astype(compute_dtype)
        # Residual + final bias folded into the accumulator (the output block's
        # index is (i, 0) for every k, so it stays VMEM-resident here).
        o_ref[...] = (x + b2_ref[...]).astype(o_ref.dtype)

    h = jnp.dot(xn_ref[...], w1_ref[...],
                preferred_element_type=jnp.float32) + b1_ref[...]
    h = jnp.maximum(h, 0.0).astype(compute_dtype)
    o_ref[...] += jnp.dot(h, w2_ref[...], preferred_element_type=jnp.float32)


def _chunked_kernel_scratch(x_ref, alpha_ref, beta_ref, w1_ref, b1_ref, w2_ref,
                            b2_ref, o_ref, xn_ref, acc_ref, *, eps, feat_dim,
                            compute_dtype, fast):
    """F-chunked reduction for non-f32 outputs (separate f32 accumulator)."""
    k = pl.program_id(1)

    @pl.when(k == 0)
    def _init():
        x = x_ref[...].astype(jnp.float32)
        xn_ref[...] = _layernorm(x, alpha_ref[0], beta_ref[0], eps, feat_dim,
                                 fast).astype(compute_dtype)
        acc_ref[...] = x + b2_ref[...]

    h = jnp.dot(xn_ref[...], w1_ref[...],
                preferred_element_type=jnp.float32) + b1_ref[...]
    h = jnp.maximum(h, 0.0).astype(compute_dtype)
    acc_ref[...] += jnp.dot(h, w2_ref[...], preferred_element_type=jnp.float32)

    @pl.when(k == pl.num_programs(1) - 1)
    def _finalize():
        o_ref[...] = acc_ref[...].astype(o_ref.dtype)


# --------------------------------------------------------------------------
# Wrapper
# --------------------------------------------------------------------------
def residual_connection_ffn(x, alpha, beta, w1, b1, w2, b2, *, eps=1e-6,
                            compute_dtype=jnp.bfloat16, tm=1024, tf=1024,
                            vmem_fraction=0.8, force_path=None):
    """out = x + FFN(LayerNorm(x)).  x: (..., E); w1: (E, F); w2: (F, E)."""
    orig_shape = x.shape
    E = int(orig_shape[-1])
    F = int(w1.shape[1])
    N = 1
    for d in orig_shape[:-1]:
        N *= int(d)

    compute_dtype = np.dtype(compute_dtype)
    fast = compute_dtype != np.dtype(np.float32)
    x2d = x.reshape(N, E)
    x_item = x2d.dtype.itemsize
    w_item = compute_dtype.itemsize
    out_is_f32 = x2d.dtype == np.dtype(np.float32)

    w1c = w1.astype(compute_dtype)
    w2c = w2.astype(compute_dtype)
    b1f = b1.astype(jnp.float32).reshape(1, F)
    b2f = b2.astype(jnp.float32).reshape(1, E)
    alpha_s = alpha.astype(jnp.float32).reshape(1)
    beta_s = beta.astype(jnp.float32).reshape(1)

    vmem_cap = int(_physical_vmem_bytes() * vmem_fraction)

    # ---- token tile ------------------------------------------------------
    tm0 = min(tm, N)
    if tm0 >= 256:
        tm0 = _round_down(tm0, 256)      # MXU-friendly M dim
    elif tm0 >= _SUBLANE:
        tm0 = _round_down(tm0, _SUBLANE)
    else:
        tm0 = N                          # tiny: one full-extent block
    if N >= 2 * _SUBLANE:
        # keep >= 2 token tiles so both v7x TensorCores get work
        tm0 = min(tm0, _round_up(pl.cdiv(N, 2), _SUBLANE))
    tm_cands = [tm0] + [c for c in (2048, 1024, 768, 512, 384, 256, 128,
                                    64, 32, 16, 8) if c < tm0]

    # ---- F (reduction) tile ------------------------------------------------
    tf0 = min(tf, F)
    if tf0 < F:
        tf0 = max(_LANE, _round_down(tf0, _LANE))
    tf_cands = [tf0] + [c for c in (4096, 2048, 1024, 512, 256, 128) if c < tf0]

    # ---- VMEM budgets (include hidden intermediates + 25% headroom) --------
    def resident_budget(t):
        wb = 2 * E * F * w_item + (F + E) * 4              # W1/W2/b1/b2 resident
        io = 2 * 2 * t * E * x_item                        # x/out tiles x2 buffers
        interm = t * F * (4 + w_item) + t * E * (4 + w_item)
        return (wb + io + interm) * 5 // 4

    def chunked_budget(t, f):
        wb = 2 * 2 * E * f * w_item + 2 * (f + E) * 4      # weight slices x2 buffers
        io = 2 * 2 * t * E * x_item
        scratch = t * E * w_item + (0 if out_is_f32 else t * E * 4)
        interm = t * f * (4 + w_item) + t * E * 4
        return (wb + io + scratch + interm) * 5 // 4

    use_resident = None if force_path is None else (force_path == "resident")

    chosen_tm = None
    if use_resident is not False:
        for t in tm_cands:
            if resident_budget(t) <= vmem_cap:
                chosen_tm = t
                break
        if chosen_tm is None and use_resident:
            chosen_tm = tm_cands[-1]

    # ======================= whole-weight-resident path =====================
    if chosen_tm is not None:
        tmc = chosen_tm
        grid = (pl.cdiv(N, tmc),)
        kernel = functools.partial(_resident_kernel, eps=eps, feat_dim=E,
                                   compute_dtype=compute_dtype, fast=fast)
        cost = pl.CostEstimate(
            flops=4 * N * E * F + 10 * N * E,
            transcendentals=2 * N,
            bytes_accessed=2 * N * E * x_item + 2 * E * F * w_item + (F + E) * 4,
        )
        out2d = pl.pallas_call(
            kernel,
            out_shape=jax.ShapeDtypeStruct((N, E), x2d.dtype),
            grid_spec=pltpu.PrefetchScalarGridSpec(
                num_scalar_prefetch=0,
                grid=grid,
                in_specs=[
                    pl.BlockSpec((tmc, E), lambda i: (i, 0)),           # x
                    pl.BlockSpec(memory_space=pltpu.MemorySpace.SMEM),  # alpha
                    pl.BlockSpec(memory_space=pltpu.MemorySpace.SMEM),  # beta
                    pl.BlockSpec((E, F), lambda i: (0, 0)),             # W1 resident
                    pl.BlockSpec((1, F), lambda i: (0, 0)),             # b1
                    pl.BlockSpec((F, E), lambda i: (0, 0)),             # W2 resident
                    pl.BlockSpec((1, E), lambda i: (0, 0)),             # b2
                ],
                out_specs=pl.BlockSpec((tmc, E), lambda i: (i, 0)),
            ),
            compiler_params=pltpu.CompilerParams(
                dimension_semantics=("parallel",),
                vmem_limit_bytes=int(min(vmem_cap,
                                         max(resident_budget(tmc),
                                             32 * 1024 * 1024))),
            ),
            cost_estimate=cost,
        )(x2d, alpha_s, beta_s, w1c, b1f, w2c, b2f)
        return out2d.reshape(orig_shape)

    # =========================== F-chunked path =============================
    chosen = None
    for t in tm_cands:              # prioritize tm: it divides weight re-streaming
        for f in tf_cands:
            if chunked_budget(t, f) <= vmem_cap:
                chosen = (t, f)
                break
        if chosen is not None:
            break
    if chosen is None:
        chosen = (tm_cands[-1], tf_cands[-1])
    tmc, tfc = chosen

    Fp = _round_up(F, tfc)
    if Fp != F:
        # Zero-padded F columns are exactly neutral: relu(xn @ 0 + 0) == 0.
        w1c = jnp.pad(w1c, ((0, 0), (0, Fp - F)))
        b1f = jnp.pad(b1f, ((0, 0), (0, Fp - F)))
        w2c = jnp.pad(w2c, ((0, Fp - F), (0, 0)))

    grid = (pl.cdiv(N, tmc), Fp // tfc)
    n_token_tiles = pl.cdiv(N, tmc)

    if out_is_f32:
        kernel = functools.partial(_chunked_kernel_accout, eps=eps, feat_dim=E,
                                   compute_dtype=compute_dtype, fast=fast)
        scratch_shapes = [pltpu.VMEM((tmc, E), compute_dtype)]
    else:
        kernel = functools.partial(_chunked_kernel_scratch, eps=eps, feat_dim=E,
                                   compute_dtype=compute_dtype, fast=fast)
        scratch_shapes = [pltpu.VMEM((tmc, E), compute_dtype),
                          pltpu.VMEM((tmc, E), jnp.float32)]

    cost = pl.CostEstimate(
        flops=4 * N * E * Fp + 10 * N * E,
        transcendentals=2 * N,
        # weights are re-streamed once per token tile (F is the inner axis)
        bytes_accessed=(2 * N * E * x_item
                        + n_token_tiles * (2 * E * Fp * w_item + (Fp + E) * 4)),
    )

    out2d = pl.pallas_call(
        kernel,
        out_shape=jax.ShapeDtypeStruct((N, E), x2d.dtype),
        grid_spec=pltpu.PrefetchScalarGridSpec(
            num_scalar_prefetch=0,
            grid=grid,
            in_specs=[
                pl.BlockSpec((tmc, E), lambda i, k: (i, 0)),        # x
                pl.BlockSpec(memory_space=pltpu.MemorySpace.SMEM),  # alpha
                pl.BlockSpec(memory_space=pltpu.MemorySpace.SMEM),  # beta
                pl.BlockSpec((E, tfc), lambda i, k: (0, k)),        # W1 F-slice
                pl.BlockSpec((1, tfc), lambda i, k: (0, k)),        # b1 F-slice
                pl.BlockSpec((tfc, E), lambda i, k: (k, 0)),        # W2 F-slice
                pl.BlockSpec((1, E), lambda i, k: (0, 0)),          # b2
            ],
            out_specs=pl.BlockSpec((tmc, E), lambda i, k: (i, 0)),
            scratch_shapes=scratch_shapes,
        ),
        compiler_params=pltpu.CompilerParams(
            dimension_semantics=("parallel", "arbitrary"),
            vmem_limit_bytes=int(min(vmem_cap,
                                     max(chunked_budget(tmc, tfc),
                                         32 * 1024 * 1024))),
        ),
        cost_estimate=cost,
    )(x2d, alpha_s, beta_s, w1c, b1f, w2c, b2f)
    return out2d.reshape(orig_shape)


if __name__ == "__main__":
    batch, seq, embedding_dim, d_ff = 2, 8, 32, 64

    key = jax.random.PRNGKey(0)
    kx, ka, kb, kw1, kb1, kw2, kb2 = jax.random.split(key, 7)

    x = jax.random.normal(kx, (batch, seq, embedding_dim), dtype=jnp.float32)

    # LayerNorm scalar parameters (module initializes alpha=1, beta=0; use
    # non-trivial values to exercise the scale/shift path).
    alpha = jax.random.uniform(ka, (1,), jnp.float32, 0.5, 1.5)
    beta = jax.random.uniform(kb, (1,), jnp.float32, -0.5, 0.5)

    # Sublayer = FeedForward block with nn.Linear-style uniform fan-in init.
    bound1 = 1.0 / (embedding_dim ** 0.5)
    w1 = jax.random.uniform(kw1, (embedding_dim, d_ff), jnp.float32, -bound1, bound1)
    b1 = jax.random.uniform(kb1, (d_ff,), jnp.float32, -bound1, bound1)
    bound2 = 1.0 / (d_ff ** 0.5)
    w2 = jax.random.uniform(kw2, (d_ff, embedding_dim), jnp.float32, -bound2, bound2)
    b2 = jax.random.uniform(kb2, (embedding_dim,), jnp.float32, -bound2, bound2)

    # Pure-JAX reference (PyTorch semantics: unbiased std, eps added to std).
    eps = 1e-6
    mean = x.mean(axis=-1, keepdims=True)
    std = jnp.std(x, axis=-1, keepdims=True, ddof=1)
    xn = alpha[0] * ((x - mean) / (std + eps)) + beta[0]
    hidden = jnp.maximum(
        jnp.dot(xn, w1, precision=jax.lax.Precision.HIGHEST) + b1, 0.0)
    ref = x + (jnp.dot(hidden, w2, precision=jax.lax.Precision.HIGHEST) + b2)

    # 1) Default fast path: bf16 MXU feeds, weights resident (relaxed tol).
    out_fast = residual_connection_ffn(x, alpha, beta, w1, b1, w2, b2)
    jax.block_until_ready(out_fast)
    assert out_fast.shape == x.shape
    assert jnp.allclose(out_fast, ref, atol=1e-1, rtol=1e-1), float(
        jnp.max(jnp.abs(out_fast - ref)))

    # 2) Strict-parity f32 compute, resident path.
    out_f32 = residual_connection_ffn(x, alpha, beta, w1, b1, w2, b2,
                                      compute_dtype=jnp.float32)
    jax.block_until_ready(out_f32)
    assert jnp.allclose(out_f32, ref, atol=1e-4, rtol=1e-4), float(
        jnp.max(jnp.abs(out_f32 - ref)))

    # 3) Strict-parity f32 compute, forced F-chunked path (exercises the
    #    output-block-accumulator reduction variant).
    out_chunk = residual_connection_ffn(x, alpha, beta, w1, b1, w2, b2,
                                        compute_dtype=jnp.float32,
                                        force_path="chunked")
    jax.block_until_ready(out_chunk)
    assert jnp.allclose(out_chunk, ref, atol=1e-4, rtol=1e-4), float(
        jnp.max(jnp.abs(out_chunk - ref)))

    print("KERNEL_OK")
</pallas_src>

<mosaic_0001>
module attributes {stable_mosaic.version = 11 : i64} {
  func.func @_resident_kernel(%arg0: i32, %arg1: memref<8x32xf32, #tpu.memory_space<vmem>>, %arg2: memref<1xf32, #tpu.memory_space<smem>>, %arg3: memref<1xf32, #tpu.memory_space<smem>>, %arg4: memref<32x64xbf16, #tpu.memory_space<vmem>>, %arg5: memref<1x64xf32, #tpu.memory_space<vmem>>, %arg6: memref<64x32xbf16, #tpu.memory_space<vmem>>, %arg7: memref<1x32xf32, #tpu.memory_space<vmem>>, %arg8: memref<8x32xf32, #tpu.memory_space<vmem>>) attributes {dimension_semantics = [#tpu.dimension_semantics<parallel>], iteration_bounds = array<i64: 2>, scalar_prefetch = 0 : i64, scratch_operands = 0 : i64, tpu.core_type = #tpu.core_type<tc>, window_params = [{transform_indices = @transform_0, window_bounds = array<i64: 8, 32>}, {transform_indices = @transform_1, window_bounds = array<i64: 1>}, {transform_indices = @transform_2, window_bounds = array<i64: 1>}, {pipeline_mode = #tpu.pipeline_mode<synchronous>, transform_indices = @transform_3, window_bounds = array<i64: 32, 64>}, {pipeline_mode = #tpu.pipeline_mode<synchronous>, transform_indices = @transform_4, window_bounds = array<i64: 1, 64>}, {pipeline_mode = #tpu.pipeline_mode<synchronous>, transform_indices = @transform_5, window_bounds = array<i64: 64, 32>}, {pipeline_mode = #tpu.pipeline_mode<synchronous>, transform_indices = @transform_6, window_bounds = array<i64: 1, 32>}, {transform_indices = @transform_7, window_bounds = array<i64: 8, 32>}]} {
    %c0 = arith.constant 0 : index
    %c0_0 = arith.constant 0 : index
    %0 = vector.load %arg1[%c0, %c0_0] : memref<8x32xf32, #tpu.memory_space<vmem>>, vector<8x32xf32>
    %c0_1 = arith.constant 0 : index
    %1 = memref.load %arg2[%c0_1] : memref<1xf32, #tpu.memory_space<smem>>
    %c0_2 = arith.constant 0 : index
    %2 = memref.load %arg3[%c0_2] : memref<1xf32, #tpu.memory_space<smem>>
    %cst = arith.constant dense<0.000000e+00> : vector<8xf32>
    %3 = vector.multi_reduction <add>, %0, %cst [1] : vector<8x32xf32> to vector<8xf32>
    %4 = vector.shape_cast %3 : vector<8xf32> to vector<8x1xf32>
    %cst_3 = arith.constant 3.200000e+01 : f32
    %5 = vector.broadcast %cst_3 : f32 to vector<8x1xf32>
    %6 = arith.divf %4, %5 : vector<8x1xf32>
    %7 = vector.broadcast %6 : vector<8x1xf32> to vector<8x32xf32>
    %8 = arith.subf %0, %7 : vector<8x32xf32>
    %9 = arith.mulf %8, %8 : vector<8x32xf32>
    %cst_4 = arith.constant dense<0.000000e+00> : vector<8xf32>
    %10 = vector.multi_reduction <add>, %9, %cst_4 [1] : vector<8x32xf32> to vector<8xf32>
    %11 = vector.shape_cast %10 : vector<8xf32> to vector<8x1xf32>
    %cst_5 = arith.constant 3.100000e+01 : f32
    %12 = vector.broadcast %cst_5 : f32 to vector<8x1xf32>
    %13 = arith.divf %11, %12 : vector<8x1xf32>
    %14 = math.sqrt %13 : vector<8x1xf32>
    %cst_6 = arith.constant 9.99999997E-7 : f32
    %15 = vector.broadcast %cst_6 : f32 to vector<8x1xf32>
    %16 = arith.addf %14, %15 : vector<8x1xf32>
    %17 = vector.broadcast %6 : vector<8x1xf32> to vector<8x32xf32>
    %18 = arith.subf %0, %17 : vector<8x32xf32>
    %19 = tpu.reciprocal %16 {approx = true} : vector<8x1xf32> -> vector<8x1xf32>
    %20 = vector.broadcast %19 : vector<8x1xf32> to vector<8x32xf32>
    %21 = arith.mulf %18, %20 : vector<8x32xf32>
    %22 = vector.broadcast %1 : f32 to vector<8x32xf32>
    %23 = arith.mulf %22, %21 : vector<8x32xf32>
    %24 = vector.broadcast %2 : f32 to vector<8x32xf32>
    %25 = arith.addf %23, %24 : vector<8x32xf32>
    %26 = arith.truncf %25 : vector<8x32xf32> to vector<8x32xbf16>
    %c0_7 = arith.constant 0 : index
    %c0_8 = arith.constant 0 : index
    %27 = vector.load %arg4[%c0_7, %c0_8] : memref<32x64xbf16, #tpu.memory_space<vmem>>, vector<32x64xbf16>
    %cst_9 = arith.constant dense<0.000000e+00> : vector<8x64xf32>
    %28 = tpu.matmul %26, %27, %cst_9 {dimension_numbers = #tpu.dot_dimension_numbers<[1], [0], [0], [1], [0, 0, 1, 1], [], []>} : vector<8x32xbf16>, vector<32x64xbf16>, vector<8x64xf32> -> vector<8x64xf32>
    %c0_10 = arith.constant 0 : index
    %c0_11 = arith.constant 0 : index
    %29 = vector.load %arg5[%c0_10, %c0_11] : memref<1x64xf32, #tpu.memory_space<vmem>>, vector<1x64xf32>
    %30 = vector.broadcast %29 : vector<1x64xf32> to vector<8x64xf32>
    %31 = arith.addf %28, %30 : vector<8x64xf32>
    %cst_12 = arith.constant 0.000000e+00 : f32
    %32 = vector.broadcast %cst_12 : f32 to vector<8x64xf32>
    %33 = arith.maximumf %31, %32 : vector<8x64xf32>
    %34 = arith.truncf %33 : vector<8x64xf32> to vector<8x64xbf16>
    %c0_13 = arith.constant 0 : index
    %c0_14 = arith.constant 0 : index
    %35 = vector.load %arg6[%c0_13, %c0_14] : memref<64x32xbf16, #tpu.memory_space<vmem>>, vector<64x32xbf16>
    %cst_15 = arith.constant dense<0.000000e+00> : vector<8x32xf32>
    %36 = tpu.matmul %34, %35, %cst_15 {dimension_numbers = #tpu.dot_dimension_numbers<[1], [0], [0], [1], [0, 0, 1, 1], [], []>} : vector<8x64xbf16>, vector<64x32xbf16>, vector<8x32xf32> -> vector<8x32xf32>
    %c0_16 = arith.constant 0 : index
    %c0_17 = arith.constant 0 : index
    %37 = vector.load %arg7[%c0_16, %c0_17] : memref<1x32xf32, #tpu.memory_space<vmem>>, vector<1x32xf32>
    %38 = vector.broadcast %37 : vector<1x32xf32> to vector<8x32xf32>
    %39 = arith.addf %36, %38 : vector<8x32xf32>
    %40 = arith.addf %0, %39 : vector<8x32xf32>
    %c0_18 = arith.constant 0 : index
    %c0_19 = arith.constant 0 : index
    %41 = vector.load %arg8[%c0_18, %c0_19] : memref<8x32xf32, #tpu.memory_space<vmem>>, vector<8x32xf32>
    tpu.vector_store %arg8[%c0_18, %c0_19], %40 {strides = array<i32>} : memref<8x32xf32, #tpu.memory_space<vmem>>, vector<8x32xf32>,
    return
  }
  func.func @transform_0(%arg0: i32) -> (i32, i32) {
    %c0_i32 = arith.constant 0 : i32
    %c0_i32_0 = arith.constant 0 : i32
    return %arg0, %c0_i32 : i32, i32
  }
  func.func @transform_1(%arg0: i32) -> i32 {
    %c0_i32 = arith.constant 0 : i32
    %c0_i32_0 = arith.constant 0 : i32
    return %c0_i32 : i32
  }
  func.func @transform_2(%arg0: i32) -> i32 {
    %c0_i32 = arith.constant 0 : i32
    %c0_i32_0 = arith.constant 0 : i32
    return %c0_i32 : i32
  }
  func.func @transform_3(%arg0: i32) -> (i32, i32) {
    %c0_i32 = arith.constant 0 : i32
    %c0_i32_0 = arith.constant 0 : i32
    %c0_i32_1 = arith.constant 0 : i32
    return %c0_i32, %c0_i32_0 : i32, i32
  }
  func.func @transform_4(%arg0: i32) -> (i32, i32) {
    %c0_i32 = arith.constant 0 : i32
    %c0_i32_0 = arith.constant 0 : i32
    %c0_i32_1 = arith.constant 0 : i32
    return %c0_i32, %c0_i32_0 : i32, i32
  }
  func.func @transform_5(%arg0: i32) -> (i32, i32) {
    %c0_i32 = arith.constant 0 : i32
    %c0_i32_0 = arith.constant 0 : i32
    %c0_i32_1 = arith.constant 0 : i32
    return %c0_i32, %c0_i32_0 : i32, i32
  }
  func.func @transform_6(%arg0: i32) -> (i32, i32) {
    %c0_i32 = arith.constant 0 : i32
    %c0_i32_0 = arith.constant 0 : i32
    %c0_i32_1 = arith.constant 0 : i32
    return %c0_i32, %c0_i32_0 : i32, i32
  }
  func.func @transform_7(%arg0: i32) -> (i32, i32) {
    %c0_i32 = arith.constant 0 : i32
    %c0_i32_0 = arith.constant 0 : i32
    return %arg0, %c0_i32 : i32, i32
  }
}

</mosaic_0001>

<bundles_post_ra>
// kernel: tpu_custom_call.1
= control target key start
LH: loop header
LB: loop body
LE: loop exit
PB: predicated region body
PF: predicated region fallthrough
CT: control target
= control target key end

     0   :  { %s879_s0 = inlined_call_operand.vmem [shape: f32[16,32], index: 0, kind: input, shape index: {}]   ;;  %s880_s1 = inlined_call_operand.<no memory space> [shape: f32[1], index: 1, kind: input, shape index: {}]   ;;  %s881_s2 = inlined_call_operand.<no memory space> [shape: f32[1], index: 2, kind: input, shape index: {}]   ;;  %s882_s3 = inlined_call_operand.vmem [shape: bf16[32,64], index: 3, kind: input, shape index: {}]   ;;  %s883_s4 = inlined_call_operand.vmem [shape: f32[1,64], index: 4, kind: input, shape index: {}]   ;;  %s884_s5 = inlined_call_operand.vmem [shape: bf16[64,32], index: 5, kind: input, shape index: {}]   ;;  %s885_s6 = inlined_call_operand.vmem [shape: f32[1,32], index: 6, kind: input, shape index: {}]   ;;  %s886_s7 = inlined_call_operand.hbm [shape: f32[16,32], index: 7, kind: output, shape index: {}]  }
   0x1   :  { %12 = sst [smem:[#allocation2]] %s880_s1 }
   0x2   :  { %13 = sst [smem:[#allocation3]] %s881_s2 }
   0x3   :  { %14 = vsyncpa [#allocation5], 0 }
   0x4   :  { %16 = vsyncpa [#allocation5 + $0x1], 0  ;;  %s746_s28 = smov 0   ;;  %s748_s29 = smov 0  }
   0x5   :  { %s750_s30 = smov 0   ;;  %s752_s8 = smov 0  }
   0x6 LB: > { %s767_s1 = sadd.s32 4294967295, %s695_s8   ;;  %s534_s2 = sadd.s32 4294967294, %s695_s8   ;;  %s695_s8 = sphi %s752_s8, %s892_s8   ;;  %s691_s30 = sphi %s750_s30, %s891_s30   ;;  %s687_s29 = sphi %s748_s29, %s890_s29   ;;  %s683_s28 = sphi %s746_s28, %s889_s28  }
   0x7   : > { %s771_s9 = sadd.s32 1, %s695_s8   ;;  %s181_s10 = sadd.s32 1, %s691_s30 }
   0x8   : > { %s178_s11 = ssub.s32 %s695_s8, %s771_s9  ;;  %p191_p0 = scmp.ne.s32.totalorder %s691_s30, %s687_s29 }
   0x9   : > { %p179_p1 = scmp.eq.s32.totalorder %s178_s11, 0  ;;  %p192_p2 = scmp.eq.s32.totalorder %s767_s1, 1 }
   0xa   : > { %p197_p3 = scmp.ne.s32.totalorder %s687_s29, %s683_s28  ;;  %p198_p4 = scmp.eq.s32.totalorder %s534_s2, 1 }
   0xb   : > { %s782_s12 = scalar_select %p179_p1, %s691_s30, %s181_s10  }
   0xc   : > { %p784_p5 = por %p192_p2, %p191_p0  ;;  %p788_p6 = por %p198_p4, %p197_p3 }
   0xd   : > { %p537_p7 = scmp.ge.s32.totalorder %s695_s8, 1  ;;  %p241_p8 = scmp.lt.s32.totalorder %s695_s8, 3 }
   0xf   : > { %p242_p9 = pnand %p537_p7, %p241_p8 }
  0x10   : > { %p272_p10 = scmp.lt.s32.totalorder (!%p242_p9), %s767_s1, 1  ;;  %vm280_vm0 = vcmask (!%p242_p9), 261120   ;;  %v623_v7 = vld [vmem:[%s882_s3] sm:$0xff] (!%p242_p9)   ;;  %v697_v8 = vmov (!%p242_p9), 0.0   ;;  %vm698_vm1 = vmmov (!%p242_p9), 0   ;;  %v624_v9 = vld [vmem:[%s882_s3 + $0x8] sm:$0xff] (!%p242_p9)  }
  0x11   : > { %245 = sbr.rel (%p242_p9) target bundleno = 807 (0x327), region = 48  ;;  %562 = vmatprep.subr.bf16.mxu0 (!%p242_p9), %v697_v8  ;;  %566 = vmatprep.mubr.msk.bf16.mxu0 (!%p242_p9), %vm698_vm1, %v697_v8  ;;  %v625_v10 = vld [vmem:[%s884_s5] sm:$0xff] (!%p242_p9)   ;;  %v626_v11 = vld [vmem:[%s884_s5 + $0x8] sm:$0xff] (!%p242_p9)   ;;  %s278_s2 = sld [smem:[#allocation2]] (!%p242_p9)  ;;  %v627_v27 = vld [vmem:[%s884_s5 + $0x10] sm:$0xff] (!%p242_p9)   ;;  %vm415_vm4 = vcmask (!%p242_p9), 523264  }
  0x12   : > { %563 = vmatpush3.bf16.msra.mxu0 (!%p242_p9), %v623_v7  ;;  %570 = vmatprep.subr.bf16.mxu1 (!%p242_p9), %v697_v8  ;;  %s279_s10 = sld [smem:[#allocation3]] (!%p242_p9)  ;;  %v628_v28 = vld [vmem:[%s884_s5 + $0x18] sm:$0xff] (!%p242_p9)   ;;  %v540_v29 = vld [vmem:[%s883_s4] ss:$0 sm:$0xff] (!%p242_p9)  ;;  %s269_s20 = sand.u32 (!%p242_p9), 1, %s687_s29  }
  0x13   : > { %564 = vmatprep.subr.bf16.mxu0 (!%p242_p9), %v697_v8  ;;  %578 = vmatprep.mubr.msk.bf16.mxu1 (!%p242_p9), %vm698_vm1, %v697_v8  ;;  %s538_s21 = sshll.u32 (!%p242_p9), %s269_s20, 3  ;;  %v544_v37 = vld [vmem:[%s885_s6] ss:$0 sm:$0xff] (!%p242_p9)  ;;  %s551_s24 = sshll.u32 (!%p242_p9), %s767_s1, 7 }
  0x14   : > { %571 = vmatpush3.bf16.msra.mxu1 (!%p242_p9), %v625_v10  ;;  %s271_s25 = scalar_lea.vmem (!%p242_p9), [#allocation4], %s538_s21 }
  0x15   : > { %572 = vmatprep.subr.bf16.mxu1 (!%p242_p9), %v697_v8  ;;  %s475_s26 = sshll.u32 (!%p242_p9), %s271_s25, 4  ;;  %s838_s26 = int_to_ptr.vmem [resolvable:$true] %s475_s26 }
  0x16   : > { %565 = vmatpush3.bf16.msra.mxu0 (!%p242_p9), %v624_v9  ;;  %s633_s11 = scalar_lea.vmem (!%p242_p9), %s838_s26, 128 }
  0x17   : > { %v303_v21 = vstv (!%p242_p9), %s278_s2  ;;  %p634_p11 = scmp.ne.s32.totalorder (!%p242_p9), %s838_s26, %s633_s11 }
  0x18   : > { %s273_s15 = scalar_select %p272_p10, %s767_s1, 1  ;;  %573 = vmatpush3.bf16.msra.mxu1 %v626_v11  ;;  %v305_v23 = vstv %s279_s10 }
  0x19   : > { %574 = vmatprep.subr.bf16.mxu1 %v697_v8  ;;  %s836_s10 = scalar_lea.hbm %s886_s7, %s551_s24  ;;  %s462_s1 = scalar_lea.sflag [#allocation5], %s269_s20 }
  0x1a   : > { %s539_s16 = sshll.u32 %s273_s15, 3  ;;  %p635_p12 = pnand %p634_p11, %p784_p5 }
  0x1b   : > { %s275_s19 = scalar_lea.vmem %s879_s0, %s539_s16  ;;  %s699_s15 = smov [#allocation4]  }
  0x1c   : > { %v799_v0 = vld [vmem:[%s275_s19] sm:$0xff]  ;;  %575 = vmatpush3.bf16.msra.mxu1 %v627_v27  ;;  %p636_p13 = pneg %p635_p12  ;;  %s637_s16 = sshll.u32 %s699_s15, 4  ;;  %s638_s16 = int_to_ptr.vmem [resolvable:$false] %s637_s16 }
  0x1d   : > { %v281_v1 = vsel %vm280_vm0, %v799_v0, 0.0  ;;  %576 = vmatprep.subr.bf16.mxu1 %v697_v8  ;;  %s639_s17 = scalar_lea.vmem %s638_s16, 256  ;;  %p640_p0 = scmp.lt.s32.totalorder %s838_s26, %s638_s16 }
  0x1e   : > { %282 = vadd.xlane.f32.xlu0 %v281_v1  ;;  %p641_p1 = scmp.lt.s32.totalorder %s639_s17, %s633_s11 }
  0x20   : > { %577 = vmatpush3.bf16.msra.mxu1 %v628_v28  ;;  %p642_p2 = por %p641_p1, %p640_p0 }
  0x22   : > { %p643_p3 = pnand %p642_p2, %p636_p13 }
  0xab   : > { %v283_v2 = vpop.xlane.xlu0 %282 }
  0xac   : > { %v285_v3 = vmul.f32 0.03125, %v283_v2 }
  0xae   : > { %v286_v4 = vsub.f32 %v799_v0, %v285_v3 }
  0xb0   : > { %v287_v5 = vmul.f32 %v286_v4, %v286_v4 }
  0xb2   : > { %v288_v6 = vsel %vm280_vm0, %v287_v5, 0.0 }
  0xb3   : > { %289 = vadd.xlane.f32.xlu0 %v288_v6 }
 0x140   : > { %v290_v12 = vpop.xlane.xlu0 %289 }
 0x141   : > { %v292_v13 = vmul.f32 0.032258064, %v290_v12 }
 0x143   : > { %629 = vrsqrt.f32 %v292_v13  ;;  %vm295_vm2 = vcmp.eq.f32.partialorder %v292_v13, inf  ;;  %v298_v16 = vand.u32 2147483648, %v292_v13  ;;  %vm297_vm3 = vcmp.eq.f32.partialorder %v292_v13, 0.0 }
 0x14d   : > { %v630_v14 = vpop.eup %629 }
 0x14e   : > { %v294_v15 = vmul.f32 %v630_v14, %v292_v13 }
 0x150   : > { %v296_v17 = vsel %vm295_vm2, %v292_v13, %v294_v15 }
 0x151   : > { %v299_v18 = vsel %vm297_vm3, %v298_v16, %v296_v17 }
 0x152   : > { %v300_v19 = vadd.f32 1e-06, %v299_v18 }
 0x154   : > { %631 = vrcp.f32 %v300_v19 }
 0x15e   : > { %v632_v20 = vpop.eup %631 }
 0x15f   : > { %v302_v22 = vmul.f32 %v632_v20, %v286_v4 }
 0x161   : > { %v304_v24 = vmul.f32 %v303_v21, %v302_v22 }
 0x163   : > { %v306_v25 = vadd.f32 %v305_v23, %v304_v24 }
 0x165   : > { %v307_v26 = vpack.c.bf16 %v306_v25, %v306_v25 }
 0x167   : > { %567 = vmatmul.mubr.msk.bf16.vlgmr.msra.gmra.mrb[0].mxu0 %vm280_vm0, %v307_v26 }
 0x23a   : > { %v368_v30 = vpop.f32.mrb[0].mxu0 }
 0x23b   : > { %v369_v31 = vadd.f32 %v540_v29, %v368_v30  ;;  %v568_v32 = vpop.f32.mrb[1].mxu0 }
 0x23c   : > { %v371_v33 = vpop.f32.mrb[2].mxu0 }
 0x23d   : > { %v374_v34 = vmax.f32 %v369_v31, 0.0  ;;  %v569_v35 = vpop.f32.mrb[3].mxu0 }
 0x23f   : > { %v375_v36 = vpack.c.bf16 %v374_v34, %v374_v34 }
 0x241   : > { %579 = vmatmul.mubr.msk.bf16.vlgmr.msra.gmra.mrb[0].mxu1 %vm415_vm4, %v375_v36 }
 0x314   : > { %v453_v38 = vpop.f32.mrb[0].mxu1 }
 0x315   : > { %v454_v39 = vadd.f32 %v544_v37, %v453_v38  ;;  %v580_v40 = vpop.f32.mrb[1].mxu1 }
 0x316   : > { %v456_v41 = vpop.f32.mrb[2].mxu1 }
 0x317   : > { %v459_v42 = vadd.f32 %v454_v39, %v799_v0  ;;  %v581_v43 = vpop.f32.mrb[3].mxu1 }
 0x319   : > { %460 = vst.msk [vmem:[%s271_s25] sm:$0xff] %vm280_vm0, %v459_v42 }
 0x31a   : > { %646 = shalt.err (!%p643_p3)
}
 0x31b   : > { %s647_s18 = scalar_lea.hbm %s836_s10, 128  ;;  %s651_s21 = scalar_lea.hbm %s886_s7, 256 }
 0x31c   : > { %p648_p4 = scmp.ne.s32.totalorder %s836_s10, %s647_s18  ;;  %p652_p9 = scmp.lt.u32.totalorder %s836_s10, %s886_s7 }
 0x31d   : > { %p653_p10 = scmp.lt.u32.totalorder %s651_s21, %s647_s18  ;;  %p655_p12 = scmp.lt.u32.totalorder %s647_s18, %s836_s10 }
 0x31e   : > { %p649_p7 = pnand %p648_p4, %p784_p5 }
 0x31f   : > { %p654_p11 = por %p653_p10, %p652_p9 }
 0x320   : > { %p650_p8 = pneg %p649_p7 }
 0x321   : > { %p656_p13 = por %p655_p12, %p654_p11 }
 0x323   : > { %p657_p0 = pnand %p656_p13, %p650_p8 }
 0x325   : > { %660 = shalt.err (!%p657_p0)
}
 0x326   : > { %582 = dma.vmem_to_hbm [thread:$0]  (%p784_p5), %s838_s26, 128, %s836_s10, %s462_s1  }
 0x327 PF: > { %p588_p1 = scmp.ge.s32.totalorder %s695_s8, 2  ;;  %s487_s24 = sand.u32 1, %s683_s28  }
 0x328   : > { %s488_s25 = scalar_lea.sflag [#allocation5], %s487_s24 }
 0x329   : > { %p585_p2 = pnand %p588_p1, %p788_p6 }
 0x32b   : > { %678 = dma.done.wait (!%p585_p2), %s488_s25, 128  }
 0x32c   : > { %680 = vsyncadd (!%p585_p2), %s488_s25, 4294967168  ;;  %p19_p3 = scmp.ge.s32.totalorder %s771_s9, 4   ;;  %s889_s28 = smov %s687_s29 }
 0x32d   : > { %s890_s29 = smov %s691_s30  ;;  %s891_s30 = smov %s782_s12 }
 0x32e   : > { %s892_s8 = smov %s771_s9  ;;  %21 = sbr.rel (!%p19_p3) target bundleno = 6 (0x6), region = 83 }
 0x335   :  { %493 = vsyncpa [#allocation5], 1 }
 0x336   :  { %495 = vsyncpa [#allocation5 + $0x1], 1 }

</bundles_post_ra>
